<compile_context>
chip_gen: v7x
topology: tpu7x:2x2x1
jax: 0.10.0
libtpu: 0.0.40
codegen_flags: <defaults>
</compile_context>

<pallas_src>
import functools

import numpy as np
import jax
import jax.numpy as jnp
from jax import lax
from jax.experimental import pallas as pl
from jax.experimental.pallas import tpu as pltpu


# --------------------------------------------------------------- effective tap weights ---
def _build_tap_weights(Wt, Wc, Wp):
    """Per-(branch, subpos, tap) effective 3x3 weights, shape (3, 4, 9, Cin, Cout).

    tap = ty*3+tx indexes the padded 3x3 input neighbourhood (x_pad[i+ty, j+tx]);
    subpos s = a*2+c is the output parity of pixel (2i+a, 2j+c).
      Wt: (Cin, Cout, 4, 4)   ConvTranspose2d(k=4, s=2, p=1)      (DconvBlock)
      Wc: (Cout, Cin, 3, 3)   3x3 conv after nearest 2x upsample  (ConvBlock)
      Wp: (4*Cout, Cin, 3, 3) 3x3 conv before PixelShuffle(2)     (PixelShuffleBlock)
    """
    cin, cout = Wt.shape[0], Wt.shape[1]
    W = np.zeros((3, 4, 9, cin, cout), np.float32)
    for a in range(2):
        for c in range(2):
            s = a * 2 + c
            # branch 0: transposed conv.  output row 2i+a pulls x[i+oy] * Wt[..., ky, kx]
            ky_map = {-1: 3, 0: 1} if a == 0 else {0: 2, 1: 0}
            kx_map = {-1: 3, 0: 1} if c == 0 else {0: 2, 1: 0}
            for oy, ky in ky_map.items():
                for ox, kx in kx_map.items():
                    W[0, s, (oy + 1) * 3 + (ox + 1)] = Wt[:, :, ky, kx]
            # branch 1: nearest up + 3x3 conv (pad 1); conv taps collapse onto x offsets
            for dy in range(3):
                oy = (a + dy - 1) // 2
                for dx in range(3):
                    ox = (c + dx - 1) // 2
                    W[1, s, (oy + 1) * 3 + (ox + 1)] += Wc[:, :, dy, dx].T
            # branch 2: 3x3 conv to 4*Cout channels + PixelShuffle(2)
            sel = np.arange(cout) * 4 + a * 2 + c
            for dy in range(3):
                for dx in range(3):
                    W[2, s, dy * 3 + dx] = Wp[sel, :, dy, dx].T
    return W


def _build_banded_weights(W5, gw):
    """Fold horizontal taps + GW-pixel column grouping into banded weights.

    Returns (3, (gw+2)*Cin, gw*12*Cout).  Row index = (u, ci) with u the input pixel inside
    the (gw+2)-wide halo window; column index = (g, branch, subpos, co); the band is zero
    unless 0 <= u-g <= 2.  One matmul per vertical tap ty computes a whole column group.
    """
    _, _, _, cin, cout = W5.shape
    c12 = 12 * cout
    kb = (gw + 2) * cin
    band = np.zeros((3, kb, gw * c12), np.float32)
    for ty in range(3):
        for g in range(gw):
            for tx in range(3):
                u = g + tx
                blk = np.transpose(W5[:, :, ty * 3 + tx], (2, 0, 1, 3)).reshape(cin, c12)
                band[ty, u * cin:(u + 1) * cin, g * c12:(g + 1) * c12] = blk
    return band


# ---------------------------------------------------------------------------- kernels ---
def _mix_stats_kernel(x_ref, w_ref, stats_ref, *, TH, GW, CIN, WD, SW):
    # x_ref:     (H+2, (W+2)*Cin) bf16 padded image (VMEM resident, revisited across tiles)
    # w_ref:     (3, (GW+2)*Cin, SW) bf16 banded per-branch weights (resident); SW=GW*12*Cout
    # stats_ref: (2, SW) f32 per-tile [sum, sum_of_squares] partials
    KB = (GW + 2) * CIN
    r0 = pl.multiple_of(pl.program_id(1) * TH, TH)
    band = x_ref[pl.ds(r0, TH + 2), :].astype(jnp.float32)   # (TH+2, (W+2)*Cin)
    tot = jnp.zeros((1, SW), jnp.float32)
    tsq = jnp.zeros((1, SW), jnp.float32)
    for jb in range(WD // GW):                               # column groups (static unroll)
        c0 = jb * GW * CIN
        acc = jnp.zeros((TH, SW), jnp.float32)
        for ty in range(3):                                  # vertical taps
            lhs = band[ty:ty + TH, c0:c0 + KB].astype(jnp.bfloat16)
            acc = acc + jnp.dot(lhs, w_ref[ty], preferred_element_type=jnp.float32)
        tot = tot + jnp.sum(acc, axis=0, keepdims=True)
        tsq = tsq + jnp.sum(acc * acc, axis=0, keepdims=True)
    stats_ref[0:1, :] = tot                                  # no concatenate (sublane writes)
    stats_ref[1:2, :] = tsq


def _mix_out_kernel(x_ref, w_ref, shift_ref, o_ref, *, TH, GW, CIN, WD, SW):
    # w_ref:     (3, (GW+2)*Cin, SW) bf16, BN scale + 3-branch average folded in; SW=GW*4*Cout
    # shift_ref: (1, SW) f32 = sum_b(beta_b/3 - mean_b*scale_b), tiled over (g, subpos)
    # o_ref:     (W//GW, TH, SW) f32 lane-dense output block (SW = 128 for the test config)
    KB = (GW + 2) * CIN
    r0 = pl.multiple_of(pl.program_id(1) * TH, TH)
    band = x_ref[pl.ds(r0, TH + 2), :].astype(jnp.float32)
    for jb in range(WD // GW):
        c0 = jb * GW * CIN
        acc = jnp.zeros((TH, SW), jnp.float32)
        for ty in range(3):
            lhs = band[ty:ty + TH, c0:c0 + KB].astype(jnp.bfloat16)
            acc = acc + jnp.dot(lhs, w_ref[ty], preferred_element_type=jnp.float32)
        o_ref[jb] = acc + shift_ref[...]                     # single wide store per group


# ----------------------------------------------------------------------- tile selection ---
def _pick_gw(width, c4):
    """Column-group width: make the output lane dim GW*4*Cout a multiple of 128 if possible."""
    for g in range(1, width + 1):
        if width % g == 0 and (g * c4) % 128 == 0:
            return g
    for g in range(1, width + 1):
        if width % g == 0 and g * c4 >= 128:
            return g
    return width


def _pick_th(height, batch):
    """Rows per grid step: multiple of 8 dividing H, preferring >=4 total grid steps (v7x)."""
    cands = [d for d in range(8, height + 1, 8) if height % d == 0] or [height]
    for d in sorted(cands, reverse=True):
        if batch * (height // d) >= 4:
            return d
    return max(cands)


# ---------------------------------------------------------------------------- wrapper ---
def mixblock_forward(x, Wt, Wc, Wp, eps=1e-5):
    """MixBlock forward: x (B, Cin, H, W) NCHW -> (B, Cout, 2H, 2W) NCHW, float32."""
    B, Cin, H, W = map(int, x.shape)
    Cout = int(Wc.shape[0])
    C4, C12 = 4 * Cout, 12 * Cout

    GW = _pick_gw(W, C4)              # 8 for the test config -> 128-lane output columns
    TH = _pick_th(H, B)               # 8 for the test config -> grid (2, 2) = 4 steps
    n_h = H // TH
    KB = (GW + 2) * Cin
    SW1, SW2 = GW * C12, GW * C4

    # ---- layout glue: NHWC pad, fold (W+2, Cin) into the lane dim, cast bf16 -------------
    # TODO(synk): for very large images the full padded image block may not fit VMEM;
    # switch to a manually double-buffered halo DMA (make_async_copy) in that regime.
    xh = jnp.transpose(x, (0, 2, 3, 1))
    x_pad = jnp.pad(xh, ((0, 0), (1, 1), (1, 1), (0, 0)))
    x2 = x_pad.reshape(B, H + 2, (W + 2) * Cin).astype(jnp.bfloat16)

    W5 = _build_tap_weights(np.asarray(Wt), np.asarray(Wc), np.asarray(Wp))
    band_f32 = jnp.asarray(_build_banded_weights(W5, GW))             # (3, KB, SW1)
    band1 = band_f32.astype(jnp.bfloat16)

    cparams = pltpu.CompilerParams(
        dimension_semantics=("parallel", "parallel"),   # shard (B, row-tiles) across TCs
        vmem_limit_bytes=64 * 1024 * 1024)              # fits v5e/v6e and v7x's 64 MiB VMEM

    # ---- phase 1: stats-only ("flash-BN"); per-tile [sum, sum_sq] partials ---------------
    stats = pl.pallas_call(
        functools.partial(_mix_stats_kernel, TH=TH, GW=GW, CIN=Cin, WD=W, SW=SW1),
        out_shape=jax.ShapeDtypeStruct((B, n_h, 2, SW1), jnp.float32),
        grid=(B, n_h),
        in_specs=[pl.BlockSpec((None, H + 2, (W + 2) * Cin), lambda b, i: (b, 0, 0)),
                  pl.BlockSpec((3, KB, SW1), lambda b, i: (0, 0, 0))],     # resident weights
        out_specs=pl.BlockSpec((None, None, 2, SW1), lambda b, i: (b, i, 0, 0)),
        compiler_params=cparams,
    )(x2, band1)

    # ---- tiny O(Cout) BN epilogue; fold scale into weights, mean/beta into one shift -----
    st = stats.sum(axis=(0, 1)).reshape(2, GW, 3, 4, Cout).sum(axis=(1, 3))  # (2, 3, Cout)
    n = jnp.float32(4 * B * H * W)               # BN sees B*(2H)*(2W) samples per channel
    mean = st[0] / n
    # TODO(synk): one-pass E[x^2]-E[x]^2 can cancel for strongly non-zero-mean channels;
    # a shifted / two-pass accumulation would be more robust in that regime.
    var = jnp.maximum(st[1] / n - mean * mean, 0.0)
    gamma = jnp.ones((3, Cout), jnp.float32)     # freshly-initialized BatchNorm2d (training)
    beta = jnp.zeros((3, Cout), jnp.float32)
    scale = gamma / (3.0 * jnp.sqrt(var + eps))                      # folds the 3-way average
    shift_ch = (beta / 3.0 - mean * scale).sum(axis=0)               # (Cout,)
    band2 = jnp.einsum('tkgbsc,bc->tkgsc',
                       band_f32.reshape(3, KB, GW, 3, 4, Cout),
                       scale).reshape(3, KB, SW2).astype(jnp.bfloat16)
    shift_col = jnp.tile(shift_ch, (4 * GW,))[None, :].astype(jnp.float32)   # (1, SW2)

    # ---- phase 2: recompute matmul with folded weights, lane-dense normalized stores -----
    out_f = pl.pallas_call(
        functools.partial(_mix_out_kernel, TH=TH, GW=GW, CIN=Cin, WD=W, SW=SW2),
        out_shape=jax.ShapeDtypeStruct((B, W // GW, H, SW2), jnp.float32),
        grid=(B, n_h),
        in_specs=[pl.BlockSpec((None, H + 2, (W + 2) * Cin), lambda b, i: (b, 0, 0)),
                  pl.BlockSpec((3, KB, SW2), lambda b, i: (0, 0, 0)),
                  pl.BlockSpec((1, SW2), lambda b, i: (0, 0))],
        out_specs=pl.BlockSpec((None, W // GW, TH, SW2), lambda b, i: (b, 0, i, 0)),
        compiler_params=cparams,
    )(x2, band2, shift_col)

    # ---- sub-pixel un-interleave to NCHW (single XLA transpose pass; pure layout glue) ---
    # out_f[b, jb, i, g*4*Cout + (a*2+c)*Cout + co] == y[b, co, 2i+a, 2*(jb*GW+g)+c]
    # TODO(synk): a consumer accepting the folded layout (and/or bf16) can skip this pass.
    y = out_f.reshape(B, W // GW, H, GW, 2, 2, Cout)
    y = jnp.transpose(y, (0, 6, 2, 4, 1, 3, 5)).reshape(B, Cout, 2 * H, 2 * W)
    return y


# ------------------------------------------------------------------ pure-JAX reference ---
def mixblock_reference(x, Wt, Wc, Wp, eps=1e-5):
    B, Cin, H, W = x.shape
    Cout = Wc.shape[0]
    dn = lax.conv_dimension_numbers(x.shape, Wc.shape, ('NCHW', 'OIHW', 'NCHW'))
    hp = lax.Precision.HIGHEST

    # DconvBlock: ConvTranspose2d(k=4, s=2, p=1) == dilated conv with flipped kernel
    Wt_conv = jnp.flip(jnp.transpose(Wt, (1, 0, 2, 3)), axis=(2, 3))
    y0 = lax.conv_general_dilated(x, Wt_conv, (1, 1), [(2, 2), (2, 2)],
                                  lhs_dilation=(2, 2), dimension_numbers=dn, precision=hp)
    # ConvBlock: nearest 2x upsample + 3x3 conv (pad 1)
    xu = jnp.repeat(jnp.repeat(x, 2, axis=2), 2, axis=3)
    y1 = lax.conv_general_dilated(xu, Wc, (1, 1), [(1, 1), (1, 1)],
                                  dimension_numbers=dn, precision=hp)
    # PixelShuffleBlock: 3x3 conv to 4*Cout + PixelShuffle(2)
    z = lax.conv_general_dilated(x, Wp, (1, 1), [(1, 1), (1, 1)],
                                 dimension_numbers=dn, precision=hp)
    y2 = z.reshape(B, Cout, 2, 2, H, W).transpose(0, 1, 4, 2, 5, 3).reshape(B, Cout, 2*H, 2*W)

    def bn(y):  # training-mode BatchNorm2d, gamma=1, beta=0
        m = y.mean(axis=(0, 2, 3), keepdims=True)
        v = ((y - m) ** 2).mean(axis=(0, 2, 3), keepdims=True)
        return (y - m) / jnp.sqrt(v + eps)

    return (bn(y0) + bn(y1) + bn(y2)) / 3.0


# ------------------------------------------------------------------------------- main ---
if __name__ == "__main__":
    B, Cin, Cout, H, W = 2, 4, 4, 16, 16
    key = jax.random.PRNGKey(0)
    k1, k2, k3, k4 = jax.random.split(key, 4)
    x = jax.random.normal(k1, (B, Cin, H, W), jnp.float32)
    # Deterministic synthetic parameters (PyTorch weight layouts, all convs bias=False):
    Wt = jax.random.normal(k2, (Cin, Cout, 4, 4), jnp.float32) * 0.2      # ConvTranspose2d
    Wc = jax.random.normal(k3, (Cout, Cin, 3, 3), jnp.float32) * 0.2      # ConvBlock conv
    Wp = jax.random.normal(k4, (4 * Cout, Cin, 3, 3), jnp.float32) * 0.2  # PixelShuffle conv

    out = jax.block_until_ready(mixblock_forward(x, Wt, Wc, Wp))
    assert out.shape == (B, Cout, 2 * H, 2 * W), out.shape

    ref = mixblock_reference(x, Wt, Wc, Wp)
    err = float(jnp.max(jnp.abs(out - ref)))
    # bf16 MXU operands (f32 accumulation, BN scale folded into bf16 weights) vs the
    # fp32-HIGHEST reference leaves ~1e-2-scale rounding on the unit-variance outputs.
    if err > 3e-2:
        raise AssertionError(f"kernel/reference mismatch, max abs err = {err}")
    print("KERNEL_OK")
</pallas_src>

<mosaic_0001>
module attributes {stable_mosaic.version = 11 : i64} {
  func.func @_mix_stats_kernel(%arg0: i32, %arg1: i32, %arg2: memref<1x18x72xbf16, #tpu.memory_space<vmem>>, %arg3: memref<3x40x384xbf16, #tpu.memory_space<vmem>>, %arg4: memref<1x1x2x384xf32, #tpu.memory_space<vmem>>) attributes {dimension_semantics = [#tpu.dimension_semantics<parallel>, #tpu.dimension_semantics<parallel>], iteration_bounds = array<i64: 2, 2>, scalar_prefetch = 0 : i64, scratch_operands = 0 : i64, tpu.core_type = #tpu.core_type<tc>, window_params = [{transform_indices = @transform_0, window_bounds = array<i64: 1, 18, 72>}, {pipeline_mode = #tpu.pipeline_mode<synchronous>, transform_indices = @transform_1, window_bounds = array<i64: 3, 40, 384>}, {transform_indices = @transform_2, window_bounds = array<i64: 1, 1, 2, 384>}]} {
    %c8_i32 = arith.constant 8 : i32
    %0 = arith.muli %arg1, %c8_i32 : i32
    %1 = tpu.assume_multiple %0, 8 : i32
    %c0 = arith.constant 0 : index
    %2 = arith.index_cast %1 : i32 to index
    %c0_0 = arith.constant 0 : index
    %3 = vector.load %arg2[%c0, %2, %c0_0] : memref<1x18x72xbf16, #tpu.memory_space<vmem>>, vector<1x10x72xbf16>
    %4 = vector.shape_cast %3 : vector<1x10x72xbf16> to vector<10x72xbf16>
    %5 = arith.extf %4 : vector<10x72xbf16> to vector<10x72xf32>
    %cst = arith.constant 0.000000e+00 : f32
    %6 = vector.broadcast %cst : f32 to vector<1x384xf32>
    %cst_1 = arith.constant 0.000000e+00 : f32
    %7 = vector.broadcast %cst_1 : f32 to vector<1x384xf32>
    %cst_2 = arith.constant 0.000000e+00 : f32
    %8 = vector.broadcast %cst_2 : f32 to vector<8x384xf32>
    %9 = vector.extract_strided_slice %5 {offsets = [0, 0], sizes = [8, 40], strides = [1, 1]} : vector<10x72xf32> to vector<8x40xf32>
    %10 = arith.truncf %9 : vector<8x40xf32> to vector<8x40xbf16>
    %c0_3 = arith.constant 0 : index
    %c0_4 = arith.constant 0 : index
    %c0_5 = arith.constant 0 : index
    %11 = vector.load %arg3[%c0_3, %c0_4, %c0_5] : memref<3x40x384xbf16, #tpu.memory_space<vmem>>, vector<1x40x384xbf16>
    %12 = vector.shape_cast %11 : vector<1x40x384xbf16> to vector<40x384xbf16>
    %cst_6 = arith.constant dense<0.000000e+00> : vector<8x384xf32>
    %13 = tpu.matmul %10, %12, %cst_6 {dimension_numbers = #tpu.dot_dimension_numbers<[1], [0], [0], [1], [0, 0, 1, 1], [], []>} : vector<8x40xbf16>, vector<40x384xbf16>, vector<8x384xf32> -> vector<8x384xf32>
    %14 = arith.addf %8, %13 : vector<8x384xf32>
    %15 = vector.extract_strided_slice %5 {offsets = [1, 0], sizes = [8, 40], strides = [1, 1]} : vector<10x72xf32> to vector<8x40xf32>
    %16 = arith.truncf %15 : vector<8x40xf32> to vector<8x40xbf16>
    %c1 = arith.constant 1 : index
    %c0_7 = arith.constant 0 : index
    %c0_8 = arith.constant 0 : index
    %17 = vector.load %arg3[%c1, %c0_7, %c0_8] : memref<3x40x384xbf16, #tpu.memory_space<vmem>>, vector<1x40x384xbf16>
    %18 = vector.shape_cast %17 : vector<1x40x384xbf16> to vector<40x384xbf16>
    %cst_9 = arith.constant dense<0.000000e+00> : vector<8x384xf32>
    %19 = tpu.matmul %16, %18, %cst_9 {dimension_numbers = #tpu.dot_dimension_numbers<[1], [0], [0], [1], [0, 0, 1, 1], [], []>} : vector<8x40xbf16>, vector<40x384xbf16>, vector<8x384xf32> -> vector<8x384xf32>
    %20 = arith.addf %14, %19 : vector<8x384xf32>
    %21 = vector.extract_strided_slice %5 {offsets = [2, 0], sizes = [8, 40], strides = [1, 1]} : vector<10x72xf32> to vector<8x40xf32>
    %22 = arith.truncf %21 : vector<8x40xf32> to vector<8x40xbf16>
    %c2 = arith.constant 2 : index
    %c0_10 = arith.constant 0 : index
    %c0_11 = arith.constant 0 : index
    %23 = vector.load %arg3[%c2, %c0_10, %c0_11] : memref<3x40x384xbf16, #tpu.memory_space<vmem>>, vector<1x40x384xbf16>
    %24 = vector.shape_cast %23 : vector<1x40x384xbf16> to vector<40x384xbf16>
    %cst_12 = arith.constant dense<0.000000e+00> : vector<8x384xf32>
    %25 = tpu.matmul %22, %24, %cst_12 {dimension_numbers = #tpu.dot_dimension_numbers<[1], [0], [0], [1], [0, 0, 1, 1], [], []>} : vector<8x40xbf16>, vector<40x384xbf16>, vector<8x384xf32> -> vector<8x384xf32>
    %26 = arith.addf %20, %25 : vector<8x384xf32>
    %cst_13 = arith.constant dense<0.000000e+00> : vector<384xf32>
    %27 = vector.multi_reduction <add>, %26, %cst_13 [0] : vector<8x384xf32> to vector<384xf32>
    %28 = vector.shape_cast %27 : vector<384xf32> to vector<1x384xf32>
    %29 = arith.addf %6, %28 : vector<1x384xf32>
    %30 = arith.mulf %26, %26 : vector<8x384xf32>
    %cst_14 = arith.constant dense<0.000000e+00> : vector<384xf32>
    %31 = vector.multi_reduction <add>, %30, %cst_14 [0] : vector<8x384xf32> to vector<384xf32>
    %32 = vector.shape_cast %31 : vector<384xf32> to vector<1x384xf32>
    %33 = arith.addf %7, %32 : vector<1x384xf32>
    %cst_15 = arith.constant 0.000000e+00 : f32
    %34 = vector.broadcast %cst_15 : f32 to vector<8x384xf32>
    %35 = vector.extract_strided_slice %5 {offsets = [0, 32], sizes = [8, 40], strides = [1, 1]} : vector<10x72xf32> to vector<8x40xf32>
    %36 = arith.truncf %35 : vector<8x40xf32> to vector<8x40xbf16>
    %c0_16 = arith.constant 0 : index
    %c0_17 = arith.constant 0 : index
    %c0_18 = arith.constant 0 : index
    %37 = vector.load %arg3[%c0_16, %c0_17, %c0_18] : memref<3x40x384xbf16, #tpu.memory_space<vmem>>, vector<1x40x384xbf16>
    %38 = vector.shape_cast %37 : vector<1x40x384xbf16> to vector<40x384xbf16>
    %cst_19 = arith.constant dense<0.000000e+00> : vector<8x384xf32>
    %39 = tpu.matmul %36, %38, %cst_19 {dimension_numbers = #tpu.dot_dimension_numbers<[1], [0], [0], [1], [0, 0, 1, 1], [], []>} : vector<8x40xbf16>, vector<40x384xbf16>, vector<8x384xf32> -> vector<8x384xf32>
    %40 = arith.addf %34, %39 : vector<8x384xf32>
    %41 = vector.extract_strided_slice %5 {offsets = [1, 32], sizes = [8, 40], strides = [1, 1]} : vector<10x72xf32> to vector<8x40xf32>
    %42 = arith.truncf %41 : vector<8x40xf32> to vector<8x40xbf16>
    %c1_20 = arith.constant 1 : index
    %c0_21 = arith.constant 0 : index
    %c0_22 = arith.constant 0 : index
    %43 = vector.load %arg3[%c1_20, %c0_21, %c0_22] : memref<3x40x384xbf16, #tpu.memory_space<vmem>>, vector<1x40x384xbf16>
    %44 = vector.shape_cast %43 : vector<1x40x384xbf16> to vector<40x384xbf16>
    %cst_23 = arith.constant dense<0.000000e+00> : vector<8x384xf32>
    %45 = tpu.matmul %42, %44, %cst_23 {dimension_numbers = #tpu.dot_dimension_numbers<[1], [0], [0], [1], [0, 0, 1, 1], [], []>} : vector<8x40xbf16>, vector<40x384xbf16>, vector<8x384xf32> -> vector<8x384xf32>
    %46 = arith.addf %40, %45 : vector<8x384xf32>
    %47 = vector.extract_strided_slice %5 {offsets = [2, 32], sizes = [8, 40], strides = [1, 1]} : vector<10x72xf32> to vector<8x40xf32>
    %48 = arith.truncf %47 : vector<8x40xf32> to vector<8x40xbf16>
    %c2_24 = arith.constant 2 : index
    %c0_25 = arith.constant 0 : index
    %c0_26 = arith.constant 0 : index
    %49 = vector.load %arg3[%c2_24, %c0_25, %c0_26] : memref<3x40x384xbf16, #tpu.memory_space<vmem>>, vector<1x40x384xbf16>
    %50 = vector.shape_cast %49 : vector<1x40x384xbf16> to vector<40x384xbf16>
    %cst_27 = arith.constant dense<0.000000e+00> : vector<8x384xf32>
    %51 = tpu.matmul %48, %50, %cst_27 {dimension_numbers = #tpu.dot_dimension_numbers<[1], [0], [0], [1], [0, 0, 1, 1], [], []>} : vector<8x40xbf16>, vector<40x384xbf16>, vector<8x384xf32> -> vector<8x384xf32>
    %52 = arith.addf %46, %51 : vector<8x384xf32>
    %cst_28 = arith.constant dense<0.000000e+00> : vector<384xf32>
    %53 = vector.multi_reduction <add>, %52, %cst_28 [0] : vector<8x384xf32> to vector<384xf32>
    %54 = vector.shape_cast %53 : vector<384xf32> to vector<1x384xf32>
    %55 = arith.addf %29, %54 : vector<1x384xf32>
    %56 = arith.mulf %52, %52 : vector<8x384xf32>
    %cst_29 = arith.constant dense<0.000000e+00> : vector<384xf32>
    %57 = vector.multi_reduction <add>, %56, %cst_29 [0] : vector<8x384xf32> to vector<384xf32>
    %58 = vector.shape_cast %57 : vector<384xf32> to vector<1x384xf32>
    %59 = arith.addf %33, %58 : vector<1x384xf32>
    %c0_30 = arith.constant 0 : index
    %c0_31 = arith.constant 0 : index
    %c0_32 = arith.constant 0 : index
    %c0_33 = arith.constant 0 : index
    %60 = vector.load %arg4[%c0_30, %c0_31, %c0_32, %c0_33] : memref<1x1x2x384xf32, #tpu.memory_space<vmem>>, vector<1x1x1x384xf32>
    %61 = vector.shape_cast %60 : vector<1x1x1x384xf32> to vector<1x384xf32>
    %62 = vector.shape_cast %55 : vector<1x384xf32> to vector<1x1x1x384xf32>
    tpu.vector_store %arg4[%c0_30, %c0_31, %c0_32, %c0_33], %62 {strides = array<i32>} : memref<1x1x2x384xf32, #tpu.memory_space<vmem>>, vector<1x1x1x384xf32>,
    %c0_34 = arith.constant 0 : index
    %c0_35 = arith.constant 0 : index
    %c1_36 = arith.constant 1 : index
    %c0_37 = arith.constant 0 : index
    %63 = vector.load %arg4[%c0_34, %c0_35, %c1_36, %c0_37] : memref<1x1x2x384xf32, #tpu.memory_space<vmem>>, vector<1x1x1x384xf32>
    %64 = vector.shape_cast %63 : vector<1x1x1x384xf32> to vector<1x384xf32>
    %65 = vector.shape_cast %59 : vector<1x384xf32> to vector<1x1x1x384xf32>
    tpu.vector_store %arg4[%c0_34, %c0_35, %c1_36, %c0_37], %65 {strides = array<i32>} : memref<1x1x2x384xf32, #tpu.memory_space<vmem>>, vector<1x1x1x384xf32>,
    return
  }
  func.func @transform_0(%arg0: i32, %arg1: i32) -> (i32, i32, i32) {
    %c0_i32 = arith.constant 0 : i32
    %c0_i32_0 = arith.constant 0 : i32
    %c0_i32_1 = arith.constant 0 : i32
    return %arg0, %c0_i32, %c0_i32_0 : i32, i32, i32
  }
  func.func @transform_1(%arg0: i32, %arg1: i32) -> (i32, i32, i32) {
    %c0_i32 = arith.constant 0 : i32
    %c0_i32_0 = arith.constant 0 : i32
    %c0_i32_1 = arith.constant 0 : i32
    %c0_i32_2 = arith.constant 0 : i32
    return %c0_i32, %c0_i32_0, %c0_i32_1 : i32, i32, i32
  }
  func.func @transform_2(%arg0: i32, %arg1: i32) -> (i32, i32, i32, i32) {
    %c0_i32 = arith.constant 0 : i32
    %c0_i32_0 = arith.constant 0 : i32
    %c0_i32_1 = arith.constant 0 : i32
    return %arg0, %arg1, %c0_i32, %c0_i32_0 : i32, i32, i32, i32
  }
}

</mosaic_0001>

<bundles_post_ra>
// kernel: tpu_custom_call.1
= control target key start
LH: loop header
LB: loop body
LE: loop exit
PB: predicated region body
PF: predicated region fallthrough
CT: control target
= control target key end

     0   :  { %s2152_s0 = inlined_call_operand.hbm [shape: bf16[2,18,72], index: 0, kind: input, shape index: {}]   ;;  %s2153_s1 = inlined_call_operand.hbm [shape: bf16[3,40,384], index: 1, kind: input, shape index: {}]   ;;  %s2154_s2 = inlined_call_operand.hbm [shape: f32[2,2,2,384], index: 2, kind: output, shape index: {}]  }
   0x1   :  { %2164 = sst [smem:[#allocation15_spill]] %s2153_s1 }
   0x2   :  { %7 = vsyncpa [#allocation3], 0 }
   0x3   :  { %9 = vsyncpa [#allocation3 + $0x1], 0 }
   0x4   :  { %10 = vsyncpa [#allocation6], 0 }
   0x5   :  { %11 = vsyncpa [#allocation4], 0 }
   0x6   :  { %13 = vsyncpa [#allocation4 + $0x1], 0  ;;  %s1727_s9 = smov 0   ;;  %s1729_s10 = smov 0  }
   0x7   :  { %s1731_s11 = smov 0   ;;  %s1733_s12 = smov 0  }
   0x8   :  { %s1735_s13 = smov 0   ;;  %s1737_s14 = smov 0  }
   0x9   :  { %s1739_s15 = smov 0   ;;  %s1741_s16 = smov 0  }
   0xa   :  { %s1743_s17 = smov 0   ;;  %s1745_s18 = smov 0  }
   0xb   :  { %s1747_s19 = smov 0  }
   0xc LB: > { %2165 = sst [smem:[#allocation11_spill]] %s1690_s17  ;;  %s1174_s20 = sadd.s32 4294967295, %s1698_s19   ;;  %s1698_s19 = sphi %s1747_s19, %s19_s19   ;;  %s1694_s18 = sphi %s1745_s18, %s2194_s18   ;;  %s1690_s17 = sphi %s1743_s17, %s2185_s17   ;;  %s1686_s16 = sphi %s1741_s16, %s2193_s16   ;;  %s1682_s15 = sphi %s1739_s15, %s2184_s15   ;;  %s1678_s14 = sphi %s1737_s14, %s2192_s14   ;;  %s1674_s13 = sphi %s1735_s13, %s2191_s13   ;;  %s1670_s12 = sphi %s1733_s12, %s2190_s12   ;;  %s1666_s11 = sphi %s1731_s11, %s2189_s11   ;;  %s1662_s10 = sphi %s1729_s10, %s2188_s10   ;;  %s1658_s9 = sphi %s1727_s9, %s2187_s9  }
   0xd   : > { %s1175_s21 = sadd.s32 4294967294, %s1698_s19   ;;  %p51_p0 = scmp.ne.s32.totalorder %s1674_s13, %s1670_s12 }
   0xe   : > { %p1783_p1 = scmp.eq.s32.totalorder %s1174_s20, 0  ;;  %s87_s23 = sadd.s32 1, %s1666_s11 }
   0xf   : > { %p97_p2 = scmp.ne.s32.totalorder %s1666_s11, %s1662_s10  ;;  %p98_p4 = scmp.eq.s32.totalorder %s1174_s20, 3 }
  0x10   : > { %s2166_s22 = scalar_select %p1783_p1, 1, 0 }
  0x11   : > { %p1792_p3 = por %p1783_p1, %p51_p0  ;;  %p103_p5 = scmp.ne.s32.totalorder %s1662_s10, %s1658_s9 }
  0x12   : > { %p104_p6 = scmp.eq.s32.totalorder %s1175_s21, 3  ;;  %p1798_p7 = por %p98_p4, %p97_p2 }
  0x13   : > { %s2167_s24 = scalar_select %p1792_p3, 1, 0 }
  0x14   : > { %s2168_s25 = scalar_select %p1798_p7, 1, 0 }
  0x15   : > { %p1176_p8 = scmp.ge.s32.totalorder %s1698_s19, 1  ;;  %p1803_p9 = por %p104_p6, %p103_p5 }
  0x16   : > { %p111_p10 = scmp.lt.s32.totalorder %s1698_s19, 5  ;;  %s1700_s28 = smov [#allocation5]  }
  0x17   : > { %s2169_s26 = scalar_select %p1803_p9, 1, 0 }
  0x18   : > { %p1808_p11 = pnand %p1176_p8, %p111_p10  ;;  %s123_s29 = sshll.u32 %s1700_s28, 4  ;;  %s124_s29 = int_to_ptr.vmem [resolvable:$true] %s123_s29 }
  0x19   : > { %2170 = sst [smem:[#allocation12_spill]] %s2169_s26  ;;  %s2173_s1 = sld [smem:[#allocation15_spill]] }
  0x1a   : > { %s2171_s27 = scalar_select %p1808_p11, 1, 0 }
  0x1b   : > { %p1365_p12 = pneg %p1808_p11 }
  0x1d   : > { %p1816_p13 = pnand %p1365_p12, %p1783_p1 }
  0x1f   : > { %s1514_s5 = scalar_lea.hbm %s2173_s1, 2880  ;;  %p1516_p2 = pneg %p1816_p13 }
  0x20   : > { %p1515_p0 = scmp.ne.s32.totalorder %s2173_s1, %s1514_s5  ;;  %p1521_p6 = scmp.lt.u32.totalorder %s1514_s5, %s2173_s1 }
  0x22   : > { %p1517_p4 = pnand %p1516_p2, %p1515_p0 }
  0x24   : > { %p1518_p5 = pneg %p1517_p4 }
  0x26   : > { %p1523_p8 = pnand %p1521_p6, %p1518_p5 }
  0x28   : > { %1526 = shalt.err (!%p1523_p8)
}
  0x29   : > { %s1527_s20 = scalar_lea.vmem %s124_s29, 2880  ;;  %p1535_p7 = scmp.lt.s32.totalorder %s124_s29, %s124_s29 }
  0x2a   : > { %p1528_p10 = scmp.ne.s32.totalorder %s124_s29, %s1527_s20  ;;  %p1536_p1 = scmp.lt.s32.totalorder %s1527_s20, %s1527_s20 }
  0x2c   : > { %p1530_p12 = pnand %p1528_p10, %p1516_p2  ;;  %p1537_p3 = por %p1536_p1, %p1535_p7 }
  0x2e   : > { %p1531_p9 = pneg %p1530_p12 }
  0x30   : > { %p1538_p11 = pnand %p1537_p3, %p1531_p9 }
  0x32   : > { %1541 = shalt.err (!%p1538_p11)
}
  0x33   : > { %s1701_s21 = smov 192   ;;  %s1702_s28 = smov 12  }
  0x34   : > { %1368 = dma.hbm_to_vmem [thread:$0]  (!%p1816_p13), %s2173_s1, 2880, %s124_s29, [#allocation6], %s1701_s21, %s1701_s21, %s1702_s28  }
  0x35   : > { %s28_s5 = sadd.s32 1, %s1690_s17  ;;  %s31_s6 = sadd.s32 1, %s1694_s18 }
  0x36   : > { %p29_p1 = scmp.ge.s32.totalorder %s28_s5, 2  ;;  %s38_s7 = sadd.s32 1, %s1678_s14 }
  0x37   : > { %p45_p3 = scmp.ne.s32.totalorder %s1678_s14, %s1674_s13  ;;  %p46_p7 = scmp.eq.s32.totalorder %s1698_s19, 0 }
  0x38   : > { %s2196_s5 = smov (%p29_p1, %s28_s5), 0  ;;  %s2198_s6 = smov (!%p29_p1, %s31_s6), %s1694_s18 }
  0x39   : > { %2174 = sst [smem:[#allocation13_spill]] %s2196_s5  ;;  %s83_s30 = ssub.s32 %s1690_s17, %s2196_s5 }
  0x3a   : > { %p33_p9 = scmp.ge.s32.totalorder %s2198_s6, 2  ;;  %p1378_p11 = scmp.lt.s32.totalorder %s1698_s19, 4 }
  0x3b   : > { %p1848_p13 = por %p46_p7, %p45_p3  ;;  %s137_s8 = sand.u32 1, %s1678_s14  }
  0x3c   : > { %s2200_s6 = smov (%p33_p9, %s2198_s6), 0  ;;  %s1351_s12 = smul.u32 12, %s137_s8 }
  0x3d   : > { %2176 = sst [smem:[#allocation14_spill]] %s2200_s6  ;;  %s35_s20 = ssub.s32 %s1694_s18, %s2200_s6 }
  0x3e   : > { %s1352_s21 = smul.u32 192, %s1694_s18  ;;  %p36_p0 = scmp.eq.s32.totalorder %s35_s20, 0 }
  0x3f   : > { %s84_s28 = sor.u32 %s83_s30, %s35_s20  ;;  %s141_s26 = scalar_lea.vmem [#allocation2], %s1351_s12 }
  0x40   : > { %p85_p2 = scmp.eq.s32.totalorder %s84_s28, 0  ;;  %s1869_s17 = scalar_lea.hbm %s2152_s0, %s1352_s21 }
  0x41   : > { %s1859_s3 = scalar_select %p36_p0, %s1678_s14, %s38_s7  }
  0x42   : > { %s1864_s4 = scalar_select %p85_p2, %s1666_s11, %s87_s23  }
  0x43   : > { %s148_s6 = sshll.u32 %s141_s26, 4  ;;  %p1877_p4 = pnand %p1378_p11, %p1848_p13  ;;  %s1871_s6 = int_to_ptr.vmem [resolvable:$true] %s148_s6 }
  0x44   : > { %s1881_s23 = scalar_lea.sflag [#allocation3], %s137_s8  ;;  %s1542_s1 = scalar_lea.hbm %s1869_s17, 192 }
  0x45   : > { %p1543_p5 = scmp.ne.s32.totalorder %s1869_s17, %s1542_s1  ;;  %p1544_p6 = pneg %p1877_p4 }
  0x46   : > { %s1547_s30 = scalar_lea.hbm %s2152_s0, 384  ;;  %p1548_p12 = scmp.lt.u32.totalorder %s1869_s17, %s2152_s0 }
  0x47   : > { %p1545_p8 = pnand %p1544_p6, %p1543_p5  ;;  %p1549_p1 = scmp.lt.u32.totalorder %s1547_s30, %s1542_s1 }
  0x48   : > { %p1551_p7 = scmp.lt.u32.totalorder %s1542_s1, %s1869_s17 }
  0x49   : > { %p1546_p10 = pneg %p1545_p8  ;;  %p1550_p3 = por %p1549_p1, %p1548_p12 }
  0x4b   : > { %p1552_p9 = por %p1551_p7, %p1550_p3 }
  0x4d   : > { %p1553_p11 = pnand %p1552_p9, %p1546_p10 }
  0x4f   : > { %1556 = shalt.err (!%p1553_p11)
}
  0x50   : > { %s1557_s8 = scalar_lea.vmem %s1871_s6, 192  ;;  %s1703_s20 = smov [#allocation2]  }
  0x51   : > { %p1558_p13 = scmp.ne.s32.totalorder %s1871_s6, %s1557_s8  ;;  %s1562_s21 = sshll.u32 %s1703_s20, 4  ;;  %s1563_s21 = int_to_ptr.vmem [resolvable:$false] %s1562_s21 }
  0x52   : > { %s1564_s28 = scalar_lea.vmem %s1563_s21, 384  ;;  %p1565_p5 = scmp.lt.s32.totalorder %s1871_s6, %s1563_s21 }
  0x53   : > { %p1560_p0 = pnand %p1558_p13, %p1544_p6  ;;  %p1566_p8 = scmp.lt.s32.totalorder %s1564_s28, %s1557_s8 }
  0x55   : > { %p1561_p2 = pneg %p1560_p0  ;;  %p1567_p12 = por %p1566_p8, %p1565_p5 }
  0x57   : > { %p1568_p1 = pnand %p1567_p12, %p1561_p2 }
  0x59   : > { %1571 = shalt.err (!%p1568_p1)
}
  0x5a   : > { %s1704_s1 = smov 64   ;;  %s1705_s26 = smov 4  }
  0x5b   : > { %1372 = dma.hbm_to_vmem [thread:$0]  (!%p1877_p4), %s1869_s17, 192, %s1871_s6, %s1881_s23, %s1704_s1, %s1704_s1, %s1705_s26  }
  0x5c   : > { %p2178_p6 = scmp.ne.s32.totalorder %s2171_s27, 0 }
  0x5d   : > { %s162_s5 = sand.u32 (!%p2178_p6), 1, %s1674_s13   ;;  %p2179_p10 = scmp.ne.s32.totalorder (!%p2178_p6), %s2167_s24, 0 }
  0x5e   : > { %160 = sbr.rel (%p2178_p6) target bundleno = 508 (0x1fc), region = 28  ;;  %s163_s29 = scalar_lea.sflag (!%p2178_p6), [#allocation3], %s162_s5 }
  0x5f   : > { %s1353_s30 = smul.u32 (!%p2178_p6), 12, %s162_s5 }
  0x61   : > { %s166_s12 = scalar_lea.vmem (!%p2178_p6), [#allocation2], %s1353_s30 }
  0x65   : > { %1645 = dma.done.wait (%p2179_p10), %s163_s29, 192  }
  0x66   : > { %1647 = vsyncadd (%p2179_p10), %s163_s29, 4294967104  ;;  %p2180_p3 = scmp.ne.s32.totalorder %s2166_s22, 0 }
  0x68   : > { %1649 = dma.done.wait (%p2180_p3), [#allocation6], 2880  }
  0x69   : > { %1651 = vsyncadd (%p2180_p3), [#allocation6], 4294964416  ;;  %s1182_s17 = sshll.u32 %s1682_s15, 3  ;;  %v1706_v0 = vmov 0.0   ;;  %v1707_v1 = vmov 0   ;;  %vm1708_vm0 = vmmov 0  }
  0x6a   : > { %s193_s27 = sshra.s32 %s1182_s17, 3  ;;  %1259 = vmatprep.subr.bf16.mxu1 %v1706_v0  ;;  %317 = vmatprep.mubr.bf16.mxu0 %v1707_v1  ;;  %v1925_v5 = vld [vmem:[#allocation5 + $0x40] ss:$12 sps:$4 sm:$0xff]   ;;  %v1927_v6 = vld [vmem:[#allocation5 + $0x3c] ss:$12 sps:$4 sm:$0xff]   ;;  %s1709_s22 = smov 96  }
  0x6b   : > { %s1183_s6 = sshll.u32 %s193_s27, 2  ;;  %1265 = vmatprep.mubr.msk.bf16.mxu1 %vm1708_vm0, %v1706_v0  ;;  %v1929_v7 = vld [vmem:[#allocation5 + $0x58] ss:$12 sps:$4 sm:$0xff]   ;;  %285 = vmatprep.subr.bf16.mxu0 %v1925_v5  ;;  %v1934_v11 = vld [vmem:[#allocation5 + $0x54] ss:$12 sps:$4 sm:$0xff]   ;;  %v222_v12 = vld [vmem:[#allocation5 + $0x6c] sm:$0xff] }
  0x6c   : > { %s196_s24 = scalar_lea.vmem %s166_s12, %s1183_s6 [#allocation2]  ;;  %286 = vmatpush1.bf16.msra.mxu0 %v1927_v6  ;;  %v1937_v13 = vld [vmem:[#allocation5 + $0x44] ss:$12 sps:$4 sm:$0xff]   ;;  %v1941_v15 = vcombine.high %v222_v12, %v222_v12  ;;  %v1192_v16 = vcombine.low %v222_v12, %v222_v12  ;;  %vm275_vm1 = vcmask 1043456   ;;  %v1944_v17 = vld [vmem:[#allocation5 + $0x5c] ss:$12 sps:$4 sm:$0xff]   ;;  %vm271_vm2 = vcmask 326656  }
  0x6d   : > { %v197_v2 = vld [vmem:[%s196_s24] sm:$0xf]  ;;  %v198_v3 = vld [vmem:[%s196_s24 + $0x4] sm:$0x1]  ;;  %287 = vmatprep.subr.bf16.mxu0 %v1929_v7  ;;  %1260 = vmatpush3.bf16.msra.mxu1 %v1937_v13  ;;  %v1494_v19 = vld [vmem:[#allocation5 + $0x74] ss:$0 sps:$4 sm:$0xff]   ;;  %v1007_v12 = vlaneseq }
  0x6e   : > { %v1185_v4 = vcombine.low %v197_v2, %v198_v3  ;;  %1261 = vmatprep.subr.bf16.mxu1 %v1706_v0  ;;  %v1184_v20 = vcombine.low %v197_v2, %v197_v2  ;;  %v1951_v21 = vsel %vm275_vm1, %v1192_v16, 0  ;;  %v1953_v22 = vld [vmem:[#allocation5 + $0x4] ss:$12 sps:$4 sm:$0xff]   ;;  %v1958_v23 = vsel %vm275_vm1, %v1494_v19, 0  ;;  %v1961_v24 = vld [vmem:[#allocation5] ss:$12 sps:$4 sm:$0xff]  }
  0x6f   : > { %v1964_v25 = vld [vmem:[#allocation5 + $0x1c] ss:$12 sps:$4 sm:$0xff]   ;;  %v210_v27 = vld [vmem:[#allocation5 + $0x30] sm:$0xff]  ;;  %v1972_v28 = vld [vmem:[#allocation5 + $0x18] ss:$12 sps:$4 sm:$0xff]   ;;  %s188_s7 = sand.u32 1, %s1662_s10  }
  0x70   : > { %v225_v8 = vshrl.u32 %v1185_v4, 16  ;;  %v227_v9 = vshll.u32 %v1185_v4, 16  ;;  %v1931_v10 = vrot.slane %v1185_v4, 1  ;;  %288 = vmatpush1.bf16.msra.mxu0 %v1934_v11  ;;  %v1967_v26 = vld [vmem:[#allocation5 + $0x8] ss:$12 sps:$4 sm:$0xff]   ;;  %v1977_v29 = vcombine.high %v210_v27, %v210_v27  ;;  %s1354_s23 = smul.u32 6, %s188_s7 }
  0x71   : > { %1195 = vmatprep.subr.msk.bf16.mxu0 %vm275_vm1, %v1941_v15  ;;  %1262 = vmatpush3.bf16.msra.mxu1 %v1944_v17  ;;  %v1204_v30 = vcombine.low %v210_v27, %v210_v27  ;;  %v1980_v31 = vld [vmem:[#allocation5 + $0x20] ss:$12 sps:$4 sm:$0xff]   ;;  %v1505_v32 = vld [vmem:[#allocation5 + $0x38] ss:$0 sps:$4 sm:$0xff]   ;;  %v1991_v34 = vld [vmem:[#allocation5 + $0x7c] ss:$12 sps:$4 sm:$0xff]  }
  0x72   : > { %v229_v14 = vrot.slane %v227_v9, 1  ;;  %866 = vrot.lane.b32.xlu1 %v1931_v10, %s1709_s22  ;;  %1263 = vmatprep.subr.bf16.mxu1 %v1706_v0  ;;  %v416_v35 = vsel %vm275_vm1, %v1505_v32, 0  ;;  %v1997_v36 = vld [vmem:[#allocation5 + $0x78] ss:$12 sps:$4 sm:$0xff]   ;;  %v2000_v37 = vld [vmem:[#allocation5 + $0x94] ss:$12 sps:$4 sm:$0xff]  }
  0x73   : > { %v1989_v33 = vsel %vm275_vm1, %v1204_v30, 0  ;;  %v1509_v38 = vld [vmem:[#allocation5 + $0x80] ss:$12 sps:$4 sm:$0xff]   ;;  %v2005_v40 = vld [vmem:[#allocation5 + $0x90] ss:$12 sps:$4 sm:$0xff]   ;;  %s1355_s8 = smul.u32 3, %s1682_s15 }
  0x74   : > { %v230_v18 = vor.u32 %v229_v14, %v225_v8  ;;  %290 = vmatpush1.bf16.msra.mxu0 %v1951_v21  ;;  %v508_v39 = vld [vmem:[#allocation5 + $0xa8] sm:$0xff]  ;;  %v1512_v43 = vld [vmem:[#allocation5 + $0x98] ss:$12 sps:$4 sm:$0xff]   ;;  %v1513_v44 = vld [vmem:[#allocation5 + $0xb0] ss:$0 sps:$4 sm:$0xff]   ;;  %s1356_s20 = smul.u32 6, %s1686_s16 }
  0x75   : > { %418 = vmatprep.subr.bf16.mxu0 %v1953_v22  ;;  %1264 = vmatpush3.bf16.msra.mxu1 %v1958_v23  ;;  %v1217_v41 = vcombine.high %v508_v39, %v508_v39  ;;  %v1216_v42 = vcombine.low %v508_v39, %v508_v39  ;;  %v562_v46 = vsel %vm275_vm1, %v1513_v44, 0  ;;  %vm1029_vm3 = vcmp.lt.s32.totalorder %v1007_v12, 384  ;;  %s190_s28 = scalar_lea.vmem [#allocation7], %s1354_s23  ;;  %s1062_s30 = scalar_lea.sflag [#allocation4], %s188_s7 }
  0x76   : > { %693 = vrot.lane.b32.xlu0 %v230_v18, %s1709_s22  ;;  %1269 = vmatprep.subr.bf16.mxu1 %v1706_v0  ;;  %s1074_s21 = sadd.s32 %s1356_s20, %s1355_s8  ;;  %s1078_s1 = sshll.u32 %s190_s28, 4  ;;  %s2090_s1 = int_to_ptr.vmem [resolvable:$true] %s1078_s1 }
  0x77   : > { %1196 = vmatmul.mubr.msk.bf16.vlgmr.msra.gmra.mrb[0].mxu0 %vm271_vm2, %v230_v18  ;;  %v556_v45 = vsel %vm275_vm1, %v1216_v42, 0  ;;  %s1232_s15 = sshll.u32 %s1074_s21, 5  ;;  %s1572_s29 = scalar_lea.vmem %s2090_s1, 96 }
  0x78   : > { %419 = vmatpush1.bf16.msra.mxu0 %v1961_v24  ;;  %450 = vmatprep.mubr.bf16.mxu0 %v1707_v1  ;;  %s2088_s5 = scalar_lea.hbm %s2154_s2, %s1232_s15  ;;  %p1573_p4 = scmp.ne.s32.totalorder %s2090_s1, %s1572_s29 }
  0x79   : > { %1266 = vmatmul.mubr.msk.bf16.vlgmr.msra.gmra.mrb[0].mxu1 %vm271_vm2, %v230_v18  ;;  %420 = vmatprep.subr.bf16.mxu0 %v1964_v25  ;;  %p2181_p7 = scmp.ne.s32.totalorder %s2168_s25, 0  ;;  %s1711_s12 = smov [#allocation7]  }
  0x7a   : > { %780 = vrot.lane.b32.xlu0 %v1184_v20, %s1709_s22  ;;  %1270 = vmatpush3.bf16.msra.mxu1 %v1967_v26  ;;  %s1576_s17 = sshll.u32 %s1711_s12, 4  ;;  %s1577_s17 = int_to_ptr.vmem [resolvable:$false] %s1576_s17 }
  0x7b   : > { %1275 = vmatprep.mubr.msk.bf16.mxu1 %vm1708_vm0, %v1706_v0  ;;  %1271 = vmatprep.subr.bf16.mxu1 %v1706_v0  ;;  %p1574_p9 = pnand %p1573_p4, %p2181_p7  ;;  %s1578_s27 = scalar_lea.vmem %s1577_s17, 192 }
  0x7c   : > { %421 = vmatpush1.bf16.msra.mxu0 %v1972_v28  ;;  %p1579_p13 = scmp.lt.s32.totalorder %s2090_s1, %s1577_s17  ;;  %p1580_p0 = scmp.lt.s32.totalorder %s1578_s27, %s1572_s29 }
  0x7d   : > { %1207 = vmatprep.subr.msk.bf16.mxu0 %vm275_vm1, %v1977_v29  ;;  %p1575_p11 = pneg %p1574_p9 }
  0x7e   : > { %1272 = vmatpush3.bf16.msra.mxu1 %v1980_v31  ;;  %p1581_p2 = por %p1580_p0, %p1579_p13 }
  0x7f   : > { %1273 = vmatprep.subr.bf16.mxu1 %v1706_v0 }
  0x80   : > { %423 = vmatpush1.bf16.msra.mxu0 %v1989_v33  ;;  %p1582_p5 = pnand %p1581_p2, %p1575_p11 }
  0x81   : > { %564 = vmatprep.subr.bf16.mxu0 %v1991_v34 }
  0x82   : > { %1274 = vmatpush3.bf16.msra.mxu1 %v416_v35 }
  0x83   : > { %1208 = vmatmul.mubr.msk.bf16.vlgmr.msra.gmra.mrb[0].mxu0 %vm271_vm2, %v1184_v20  ;;  %1279 = vmatprep.subr.bf16.mxu1 %v1706_v0 }
  0x84   : > { %565 = vmatpush1.bf16.msra.mxu0 %v1997_v36  ;;  %596 = vmatprep.mubr.bf16.mxu0 %v1707_v1 }
  0x85   : > { %1276 = vmatmul.mubr.msk.bf16.vlgmr.msra.gmra.mrb[0].mxu1 %vm271_vm2, %v1184_v20  ;;  %566 = vmatprep.subr.bf16.mxu0 %v2000_v37  ;;  %v2074_v20 = vshrl.u32 %v1007_v12, 7 }
  0x86   : > { %1280 = vmatpush3.bf16.msra.mxu1 %v1509_v38  ;;  %1285 = vmatprep.mubr.msk.bf16.mxu1 %vm1708_vm0, %v1706_v0 }
  0x87   : > { %1281 = vmatprep.subr.bf16.mxu1 %v1706_v0 }
  0x88   : > { %567 = vmatpush1.bf16.msra.mxu0 %v2005_v40 }
  0x89   : > { %1219 = vmatprep.subr.msk.bf16.mxu0 %vm275_vm1, %v1217_v41 }
  0x8a   : > { %1282 = vmatpush3.bf16.msra.mxu1 %v1512_v43 }
  0x8b   : > { %1283 = vmatprep.subr.bf16.mxu1 %v1706_v0 }
  0x8c   : > { %569 = vmatpush1.bf16.msra.mxu0 %v556_v45 }
  0x8d   : > { %698 = vmatprep.subr.bf16.mxu0 %v1925_v5 }
  0x8e   : > { %1284 = vmatpush3.bf16.msra.mxu1 %v562_v46 }
  0x8f   : > { %1220 = vmatmul.mubr.msk.bf16.vlgmr.msra.gmra.mrb[0].mxu0 %vm271_vm2, %v1931_v10  ;;  %1289 = vmatprep.subr.bf16.mxu1 %v1706_v0 }
  0x90   : > { %699 = vmatpush1.bf16.msra.mxu0 %v1927_v6  ;;  %730 = vmatprep.mubr.bf16.mxu0 %v1707_v1 }
  0x91   : > { %1286 = vmatmul.mubr.msk.bf16.vlgmr.msra.gmra.mrb[0].mxu1 %vm271_vm2, %v1931_v10  ;;  %700 = vmatprep.subr.bf16.mxu0 %v1929_v7  ;;  %v1710_v10 = vmov 1966171168  }
  0x92   : > { %1290 = vmatpush3.bf16.msra.mxu1 %v1937_v13  ;;  %1295 = vmatprep.mubr.msk.bf16.mxu1 %vm1708_vm0, %v1706_v0 }
  0x93   : > { %1291 = vmatprep.subr.bf16.mxu1 %v1706_v0 }
  0x94   : > { %701 = vmatpush1.bf16.msra.mxu0 %v1934_v11  ;;  %v2070_v11 = vunpack.c.l.s4 %v1710_v10 }
  0x95   : > { %1222 = vmatprep.subr.msk.bf16.mxu0 %vm275_vm1, %v1941_v15 }
  0x96   : > { %1292 = vmatpush3.bf16.msra.mxu1 %v1944_v17  ;;  %v1006_v19 = vunpack.c.0.s8 %v2070_v11 }
  0x97   : > { %1293 = vmatprep.subr.bf16.mxu1 %v1706_v0 }
  0x98   : > { %703 = vmatpush1.bf16.msra.mxu0 %v1951_v21 }
  0x99   : > { %785 = vmatprep.subr.bf16.mxu0 %v1953_v22 }
  0x9a   : > { %1294 = vmatpush3.bf16.msra.mxu1 %v1958_v23 }
  0x9b   : > { %1299 = vmatprep.subr.bf16.mxu1 %v1706_v0 }
  0xe4   : > { %v867_v49 = vpop.permute.xlu1 %866 }
  0xe8   : > { %v694_v47 = vpop.permute.xlu0 %693 }
  0xe9   : > { %1223 = vmatmul.mubr.msk.bf16.vlgmr.msra.gmra.mrb[4].mxu0 %vm271_vm2, %v694_v47  ;;  %1296 = vmatmul.mubr.msk.bf16.vlgmr.msra.gmra.mrb[4].mxu1 %vm271_vm2, %v694_v47 }
  0xea   : > { %786 = vmatpush1.bf16.msra.mxu0 %v1961_v24  ;;  %1300 = vmatpush3.bf16.msra.mxu1 %v1967_v26 }
  0xeb   : > { %787 = vmatprep.subr.bf16.mxu0 %v1964_v25  ;;  %1301 = vmatprep.subr.bf16.mxu1 %v1706_v0 }
  0xec   : > { %817 = vmatprep.mubr.bf16.mxu0 %v1707_v1  ;;  %1305 = vmatprep.mubr.msk.bf16.mxu1 %vm1708_vm0, %v1706_v0  ;;  %v781_v48 = vpop.permute.xlu0 %780 }
  0xee   : > { %788 = vmatpush1.bf16.msra.mxu0 %v1972_v28  ;;  %1302 = vmatpush3.bf16.msra.mxu1 %v1980_v31 }
  0xef   : > { %1225 = vmatprep.subr.msk.bf16.mxu0 %vm275_vm1, %v1977_v29  ;;  %1303 = vmatprep.subr.bf16.mxu1 %v1706_v0 }
  0xf2   : > { %790 = vmatpush1.bf16.msra.mxu0 %v1989_v33  ;;  %1304 = vmatpush3.bf16.msra.mxu1 %v416_v35 }
  0xf3   : > { %871 = vmatprep.subr.bf16.mxu0 %v1991_v34  ;;  %1309 = vmatprep.subr.bf16.mxu1 %v1706_v0 }
  0xf5   : > { %1226 = vmatmul.mubr.msk.bf16.vlgmr.msra.gmra.mrb[4].mxu0 %vm271_vm2, %v781_v48  ;;  %1306 = vmatmul.mubr.msk.bf16.vlgmr.msra.gmra.mrb[4].mxu1 %vm271_vm2, %v781_v48 }
  0xf6   : > { %872 = vmatpush1.bf16.msra.mxu0 %v1997_v36  ;;  %1310 = vmatpush3.bf16.msra.mxu1 %v1509_v38 }
  0xf7   : > { %873 = vmatprep.subr.bf16.mxu0 %v2000_v37  ;;  %1311 = vmatprep.subr.bf16.mxu1 %v1706_v0 }
  0xf8   : > { %903 = vmatprep.mubr.bf16.mxu0 %v1707_v1  ;;  %1315 = vmatprep.mubr.msk.bf16.mxu1 %vm1708_vm0, %v1706_v0 }
  0xfa   : > { %874 = vmatpush1.bf16.msra.mxu0 %v2005_v40  ;;  %1312 = vmatpush3.bf16.msra.mxu1 %v1512_v43 }
  0xfb   : > { %1228 = vmatprep.subr.msk.bf16.mxu0 %vm275_vm1, %v1217_v41  ;;  %1313 = vmatprep.subr.bf16.mxu1 %v1706_v0 }
  0xfe   : > { %876 = vmatpush1.bf16.msra.mxu0 %v556_v45  ;;  %1314 = vmatpush3.bf16.msra.mxu1 %v562_v46 }
 0x101   : > { %1229 = vmatmul.mubr.msk.bf16.vlgmr.msra.gmra.mrb[4].mxu0 %vm271_vm2, %v867_v49  ;;  %1316 = vmatmul.mubr.msk.bf16.vlgmr.msra.gmra.mrb[4].mxu1 %vm271_vm2, %v867_v49 }
 0x162   : > { %v598_v50 = vpop.f32.mrb[0].mxu0 }
 0x163   : > { %v600_v51 = vpop.f32.mrb[1].mxu0  ;;  %v648_v58 = vrot.slane %v598_v50, 4  ;;  %v669_v59 = vmul.f32 %v598_v50, %v598_v50 }
 0x164   : > { %v639_v52 = vpop.f32.mrb[0].mxu1  ;;  %v602_v53 = vpop.f32.mrb[2].mxu0  ;;  %v654_v60 = vrot.slane %v600_v51, 4  ;;  %v670_v61 = vmul.f32 %v600_v51, %v600_v51 }
 0x165   : > { %v603_v54 = vpop.f32.mrb[3].mxu0  ;;  %v1287_v55 = vpop.f32.mrb[1].mxu1  ;;  %v649_v62 = vadd.f32 %v648_v58, %v598_v50  ;;  %v672_v63 = vrot.slane %v669_v59, 4  ;;  %v660_v0 = vrot.slane %v639_v52, 4  ;;  %v671_v1 = vmul.f32 %v639_v52, %v639_v52 }
 0x166   : > { %v642_v56 = vpop.f32.mrb[2].mxu1  ;;  %v655_v2 = vadd.f32 %v654_v60, %v600_v51  ;;  %v678_v3 = vrot.slane %v670_v61, 4 }
 0x167   : > { %v1288_v57 = vpop.f32.mrb[3].mxu1  ;;  %v650_v4 = vrot.slane %v649_v62, 2  ;;  %v673_v5 = vadd.f32 %v672_v63, %v669_v59  ;;  %v661_v6 = vadd.f32 %v660_v0, %v639_v52  ;;  %v684_v7 = vrot.slane %v671_v1, 4 }
 0x168   : > { %v656_v8 = vrot.slane %v655_v2, 2  ;;  %v679_v9 = vadd.f32 %v678_v3, %v670_v61 }
 0x169   : > { %v651_v13 = vadd.f32 %v650_v4, %v649_v62  ;;  %v674_v14 = vrot.slane %v673_v5, 2  ;;  %v662_v15 = vrot.slane %v661_v6, 2  ;;  %v685_v16 = vadd.f32 %v684_v7, %v671_v1 }
 0x16a   : > { %v657_v17 = vadd.f32 %v656_v8, %v655_v2  ;;  %v680_v18 = vrot.slane %v679_v9, 2 }
 0x16b   : > { %v652_v21 = vrot.slane %v651_v13, 1  ;;  %v675_v22 = vadd.f32 %v674_v14, %v673_v5  ;;  %v663_v23 = vadd.f32 %v662_v15, %v661_v6  ;;  %v686_v24 = vrot.slane %v685_v16, 2 }
 0x16c   : > { %v658_v33 = vrot.slane %v657_v17, 1  ;;  %v681_v34 = vadd.f32 %v680_v18, %v679_v9 }
 0x16d   : > { %v653_v45 = vadd.f32 %v652_v21, %v651_v13  ;;  %v687_v46 = vadd.f32 %v686_v24, %v685_v16  ;;  %v676_v53 = vrot.slane %v675_v22, 1  ;;  %v664_v54 = vrot.slane %v663_v23, 1 }
 0x16e   : > { %v659_v61 = vadd.f32 %v658_v33, %v657_v17  ;;  %v682_v5 = vrot.slane %v681_v34, 1 }
 0x16f   : > { %v688_v62 = vrot.slane %v687_v46, 1  ;;  %v665_v6 = vadd.f32 %v664_v54, %v663_v23  ;;  %v677_v15 = vadd.f32 %v676_v53, %v675_v22 }
 0x170   : > { %v683_v23 = vadd.f32 %v682_v5, %v681_v34 }
 0x171   : > { %v689_v16 = vadd.f32 %v688_v62, %v687_v46 }
 0x1d4   : > { %v905_v25 = vpop.f32.mrb[4].mxu0  ;;  %v946_v26 = vpop.f32.mrb[4].mxu1 }
 0x1d5   : > { %v955_v27 = vrot.slane %v905_v25, 4  ;;  %v976_v28 = vmul.f32 %v905_v25, %v905_v25  ;;  %v967_v29 = vrot.slane %v946_v26, 4  ;;  %v978_v30 = vmul.f32 %v946_v26, %v946_v26  ;;  %v907_v31 = vpop.f32.mrb[5].mxu0  ;;  %v1317_v32 = vpop.f32.mrb[5].mxu1 }
 0x1d6   : > { %v961_v35 = vrot.slane %v907_v31, 4  ;;  %v977_v36 = vmul.f32 %v907_v31, %v907_v31  ;;  %v909_v37 = vpop.f32.mrb[6].mxu0  ;;  %v949_v38 = vpop.f32.mrb[6].mxu1 }
 0x1d7   : > { %v956_v39 = vadd.f32 %v955_v27, %v905_v25  ;;  %v979_v40 = vrot.slane %v976_v28, 4  ;;  %v968_v41 = vadd.f32 %v967_v29, %v946_v26  ;;  %v991_v42 = vrot.slane %v978_v30, 4  ;;  %v910_v43 = vpop.f32.mrb[7].mxu0  ;;  %v1318_v44 = vpop.f32.mrb[7].mxu1 }
 0x1d8   : > { %v962_v47 = vadd.f32 %v961_v35, %v907_v31  ;;  %v985_v48 = vrot.slane %v977_v36, 4  ;;  %v1009_v27 = vsub.s32 %v1006_v19, %v2074_v20 }
 0x1d9   : > { %v957_v49 = vrot.slane %v956_v39, 2  ;;  %v980_v50 = vadd.f32 %v979_v40, %v976_v28  ;;  %v969_v51 = vrot.slane %v968_v41, 2  ;;  %v992_v52 = vadd.f32 %v991_v42, %v978_v30 }
 0x1da   : > { %v963_v55 = vrot.slane %v962_v47, 2  ;;  %v986_v56 = vadd.f32 %v985_v48, %v977_v36 }
 0x1db   : > { %v958_v57 = vadd.f32 %v957_v49, %v956_v39  ;;  %v981_v58 = vrot.slane %v980_v50, 2  ;;  %v970_v59 = vadd.f32 %v969_v51, %v968_v41  ;;  %v993_v60 = vrot.slane %v992_v52, 2 }
 0x1dc   : > { %v964_v63 = vadd.f32 %v963_v55, %v962_v47  ;;  %v987_v0 = vrot.slane %v986_v56, 2 }
 0x1dd   : > { %v959_v1 = vrot.slane %v958_v57, 1  ;;  %v982_v2 = vadd.f32 %v981_v58, %v980_v50  ;;  %v971_v3 = vrot.slane %v970_v59, 1  ;;  %v994_v4 = vadd.f32 %v993_v60, %v992_v52 }
 0x1de   : > { %v965_v7 = vrot.slane %v964_v63, 1  ;;  %v988_v8 = vadd.f32 %v987_v0, %v986_v56 }
 0x1df   : > { %v960_v9 = vadd.f32 %v959_v1, %v958_v57  ;;  %v983_v10 = vrot.slane %v982_v2, 1  ;;  %v972_v13 = vadd.f32 %v971_v3, %v970_v59  ;;  %v995_v14 = vrot.slane %v994_v4, 1 }
 0x1e0   : > { %v966_v17 = vadd.f32 %v965_v7, %v964_v63  ;;  %v989_v18 = vrot.slane %v988_v8, 1 }
 0x1e1   : > { %v973_v21 = vadd.f32 %v960_v9, %v653_v45  ;;  %v984_v24 = vadd.f32 %v983_v10, %v982_v2  ;;  %v975_v25 = vadd.f32 %v972_v13, %v665_v6  ;;  %v996_v26 = vadd.f32 %v995_v14, %v994_v4 }
 0x1e2   : > { %v974_v28 = vadd.f32 %v966_v17, %v659_v61  ;;  %v990_v29 = vadd.f32 %v989_v18, %v988_v8 }
 0x1e3   : > { %v997_v30 = vadd.f32 %v984_v24, %v677_v15  ;;  %v999_v22 = vadd.f32 %v996_v26, %v689_v16  ;;  %v1017_v33 = vrot.slane %v975_v25, %v1009_v27 }
 0x1e4   : > { %v998_v31 = vadd.f32 %v990_v29, %v683_v23  ;;  %v1003_v32 = vcombine.low %v973_v21, %v974_v28 }
 0x1e5   : > { %v1049_v37 = vrot.slane %v999_v22, %v1009_v27 }
 0x1e6   : > { %v1010_v35 = vrot.slane %v1003_v32, %v1009_v27  ;;  %v1035_v36 = vcombine.low %v997_v30, %v998_v31 }
 0x1e8   : > { %v1018_v38 = vcombine.low %v1010_v35, %v1017_v33  ;;  %v1042_v34 = vrot.slane %v1035_v36, %v1009_v27 }
 0x1ea   : > { %v1050_v11 = vcombine.low %v1042_v34, %v1049_v37  ;;  %v1025_v19 = vrot.slane %v1018_v38, %v1009_v27 }
 0x1ec   : > { %1031 = vst.msk [vmem:[%s190_s28] ss:$2 sm:$0x7] %vm1029_vm3, %v1025_v19  ;;  %v1057_v20 = vrot.slane %v1050_v11, %v1009_v27 }
 0x1ee   : > { %1231 = vst.msk [vmem:[%s190_s28 + $0x1] ss:$2 sm:$0x7] %vm1029_vm3, %v1057_v20 }
 0x1ef   : > { %1585 = shalt.err (!%p1582_p5)
}
 0x1f0   : > { %s1586_s6 = scalar_lea.hbm %s2088_s5, 96  ;;  %s1590_s7 = scalar_lea.hbm %s2154_s2, 384 }
 0x1f1   : > { %p1587_p8 = scmp.ne.s32.totalorder %s2088_s5, %s1586_s6  ;;  %p1591_p6 = scmp.lt.u32.totalorder %s2088_s5, %s2154_s2 }
 0x1f2   : > { %p1592_p10 = scmp.lt.u32.totalorder %s1590_s7, %s1586_s6  ;;  %p1594_p4 = scmp.lt.u32.totalorder %s1586_s6, %s2088_s5 }
 0x1f3   : > { %p1588_p12 = pnand %p1587_p8, %p2181_p7 }
 0x1f4   : > { %p1593_p3 = por %p1592_p10, %p1591_p6 }
 0x1f5   : > { %p1589_p1 = pneg %p1588_p12 }
 0x1f6   : > { %p1595_p9 = por %p1594_p4, %p1593_p3 }
 0x1f8   : > { %p1596_p11 = pnand %p1595_p9, %p1589_p1 }
 0x1fa   : > { %1599 = shalt.err (!%p1596_p11)
}
 0x1fb   : > { %1363 = dma.vmem_to_hbm [thread:$0]  (%p2181_p7), %s2090_s1, 96, %s2088_s5, %s1062_s30  }
 0x1fc PF: > { %s2182_s20 = sld [smem:[#allocation12_spill]]  ;;  %p1380_p13 = scmp.ge.s32.totalorder %s1698_s19, 2 }
 0x1fd   : > { %s1090_s21 = sand.u32 1, %s1658_s9  }
 0x1fe   : > { %s1091_s15 = scalar_lea.sflag [#allocation4], %s1090_s21 }
 0x202   : > { %p2183_p0 = scmp.ne.s32.totalorder %s2182_s20, 0 }
 0x204   : > { %p1374_p2 = pnand %p1380_p13, %p2183_p0 }
 0x206   : > { %1653 = dma.done.wait (!%p1374_p2), %s1091_s15, 96  }
 0x207   : > { %1655 = vsyncadd (!%p1374_p2), %s1091_s15, 4294967200  ;;  %s19_s19 = sadd.s32 1, %s1698_s19   ;;  %s2184_s15 = sld [smem:[#allocation11_spill]] }
 0x208   : > { %p16_p5 = scmp.ge.s32.totalorder %s19_s19, 6   ;;  %s2185_s17 = sld [smem:[#allocation13_spill]] }
 0x209   : > { %s2186_s25 = sld [smem:[#allocation14_spill]]  ;;  %s2187_s9 = smov %s1662_s10 }
 0x20a   : > { %s2188_s10 = smov %s1666_s11  ;;  %s2189_s11 = smov %s1864_s4 }
 0x20b   : > { %s2190_s12 = smov %s1674_s13  ;;  %s2191_s13 = smov %s1678_s14 }
 0x20c   : > { %s2192_s14 = smov %s1859_s3  ;;  %s2193_s16 = smov %s1694_s18 }
 0x20d   :  { %18 = sbr.rel (!%p16_p5) target bundleno = 12 (0xc), region = 81 }
 0x20f   : > { %s2194_s18 = smov %s2186_s25 }
 0x214   :  { %1096 = vsyncpa [#allocation3], 1 }
 0x215   :  { %1098 = vsyncpa [#allocation3 + $0x1], 1 }
 0x216   :  { %1099 = vsyncpa [#allocation6], 1 }
 0x217   :  { %1100 = vsyncpa [#allocation4], 1 }
 0x218   :  { %1102 = vsyncpa [#allocation4 + $0x1], 1 }

</bundles_post_ra>
